<compile_context>
chip_gen: v5e
topology: v5e:2x2
jax: 0.10.0
libtpu: 0.0.40
codegen_flags: <defaults>
</compile_context>

<pallas_src>
import functools
import numpy as np

import jax
import jax.numpy as jnp
from jax.experimental import pallas as pl
from jax.experimental.pallas import tpu as pltpu

NEG_INF = -1e30


# ----------------------------------------------------------------------------
# helpers
# ----------------------------------------------------------------------------

def _round_up(n, m):
    return ((n + m - 1) // m) * m


def _row_tile(n, max_tile=512):
    """Row tile (multiple of 8) and padded row count so the tile divides it."""
    tile = min(max_tile, _round_up(n, 8))
    n_pad = _round_up(n, tile)
    return tile, n_pad


def _pad_rows(x, n_pad):
    pad = n_pad - x.shape[0]
    if pad == 0:
        return x
    return jnp.pad(x, ((0, pad), (0, 0)))


# ----------------------------------------------------------------------------
# Pallas kernels
# ----------------------------------------------------------------------------

def _encode_mask_kernel(x_ref, w_ref, b_ref, m_ref, cmask_ref, mtok_ref,
                        tok_ref, mtok_out_ref):
    """Fused synthetic encoder + mask-token substitution (lane-padded output).

    tokens        = relu(x @ [ws | wf | 0pad] + [bs | bf | 0])     (bf16 matmul)
    masked_tokens = tokens with hf-half replaced by mask_token on masked rows.
    """
    h = jnp.dot(x_ref[...].astype(jnp.bfloat16), w_ref[...],
                preferred_element_type=jnp.float32)
    tok = jnp.maximum(h + b_ref[...], 0.0)
    tok_ref[...] = tok
    sel = (m_ref[...] * cmask_ref[...]) > 0.5            # (tm,1)*(1,Wp) -> (tm,Wp)
    mtok_out_ref[...] = jnp.where(sel, mtok_ref[...], tok)


def _pred_mlp_kernel(x_ref, w1_ref, b1_ref, w2_ref, b2_ref, o_ref):
    """Fused readout MLP: sigmoid(relu(x@w1+b1) . w2 + b2).

    First matmul runs in bf16 on the MXU (hidden padded to 128 lanes); the
    second "matmul" has a single useful output column, so it is a VPU
    broadcast-multiply + lane reduction instead of an MXU op.
    """
    h = jnp.maximum(
        jnp.dot(x_ref[...].astype(jnp.bfloat16), w1_ref[...],
                preferred_element_type=jnp.float32) + b1_ref[...], 0.0)
    y = jnp.sum(h * w2_ref[...], axis=-1, keepdims=True) + b2_ref[...]
    o_ref[...] = jax.nn.sigmoid(y)


def _tf_stack_kernel(tok_ref, vmask_ref,
                     wqkv_ref, bqkv_ref, wo_ref, bo_ref,
                     ln1g_ref, ln1b_ref, ff1w_ref, ff1b_ref,
                     ff2w_ref, ff2b_ref, ln2g_ref, ln2b_ref,
                     o_ref, *, nhead, nlayer, dh, d_true, seq, eps):
    """Whole post-norm nn.TransformerEncoder stack for Bt batch elements.

    tok_ref block is the flattened (Bt*seq, Dp) activation slab: all shared
    matmuls (QKV, out-proj, FFN) see a fat M; the per-batch-element attention
    is enforced with a static block-diagonal mask plus the key-padding mask.
    Heads are lane-padded to 128 so every slice is 128-lane aligned.
    LayerNorm statistics use the true d_model columns only (padded lanes are 0).
    """
    M, Dp = tok_ref.shape
    DHp = wo_ref.shape[1] // nhead
    scale = 1.0 / float(np.sqrt(dh))
    inv_d = 1.0 / float(d_true)

    x = tok_ref[...]                                      # (M, Dp) f32

    # attention bias: key-padding mask + block-diagonal (same batch element)
    key_bias = (1.0 - vmask_ref[0]) * NEG_INF             # (1, M)
    row_b = jax.lax.broadcasted_iota(jnp.int32, (M, M), 0) // seq
    col_b = jax.lax.broadcasted_iota(jnp.int32, (M, M), 1) // seq
    bias = jnp.where(row_b == col_b, 0.0, NEG_INF) + key_bias   # (M, M)

    def layer_norm(y, g, b):
        # padded lanes of y are exactly 0, so plain sums give true-d statistics
        mu = jnp.sum(y, axis=-1, keepdims=True) * inv_d
        msq = jnp.sum(y * y, axis=-1, keepdims=True) * inv_d
        var = msq - mu * mu
        return (y - mu) * jax.lax.rsqrt(var + eps) * g + b

    for l in range(nlayer):
        # ---- multi-head self-attention (lane-padded heads, no concat) ----
        xb = x.astype(jnp.bfloat16)
        qkv = jnp.dot(xb, wqkv_ref[l],
                      preferred_element_type=jnp.float32) + bqkv_ref[l]
        attn = jnp.zeros((M, Dp), jnp.float32)
        for h in range(nhead):
            q = qkv[:, h * DHp:(h + 1) * DHp].astype(jnp.bfloat16)
            k = qkv[:, (nhead + h) * DHp:(nhead + h + 1) * DHp].astype(jnp.bfloat16)
            v = qkv[:, (2 * nhead + h) * DHp:(2 * nhead + h + 1) * DHp].astype(jnp.bfloat16)
            s = jax.lax.dot_general(q, k, (((1,), (1,)), ((), ())),
                                    preferred_element_type=jnp.float32) * scale
            s = s + bias
            s = s - jnp.max(s, axis=-1, keepdims=True)
            p = jnp.exp(s)
            p = p * pl.reciprocal(jnp.sum(p, axis=-1, keepdims=True), approx=True)
            o_h = jnp.dot(p.astype(jnp.bfloat16), v,
                          preferred_element_type=jnp.float32)
            # concat_h(o_h) @ Wo == sum_h o_h @ Wo_h   (Wo_h lane/sublane padded)
            attn = attn + jnp.dot(o_h.astype(jnp.bfloat16),
                                  wo_ref[l, h * DHp:(h + 1) * DHp, :],
                                  preferred_element_type=jnp.float32)
        attn = attn + bo_ref[l]
        x = layer_norm(x + attn, ln1g_ref[l], ln1b_ref[l])

        # ---- feed-forward ----
        xb = x.astype(jnp.bfloat16)
        ffh = jnp.maximum(
            jnp.dot(xb, ff1w_ref[l], preferred_element_type=jnp.float32)
            + ff1b_ref[l], 0.0)
        ff = jnp.dot(ffh.astype(jnp.bfloat16), ff2w_ref[l],
                     preferred_element_type=jnp.float32) + ff2b_ref[l]
        x = layer_norm(x + ff, ln2g_ref[l], ln2b_ref[l])

    o_ref[...] = x                                        # (M, 128): lane-dense store


# ----------------------------------------------------------------------------
# kernel wrappers
# ----------------------------------------------------------------------------

def encode_and_mask(p, x, mask_bool, mask_token, dim_hidden, out_width=128):
    """(hs, hf) encoder + mask-token substitution; output lane-padded to out_width."""
    N, F = x.shape
    D = dim_hidden
    D2 = 2 * D
    Wp = max(out_width, _round_up(D2, 128))

    w = (jnp.zeros((F, Wp), jnp.float32)
         .at[:, :D].set(p["ws"])
         .at[:, D:D2].set(p["wf"])).astype(jnp.bfloat16)
    b = (jnp.zeros((1, Wp), jnp.float32)
         .at[0, :D].set(p["bs"])
         .at[0, D:D2].set(p["bf"]))
    colmask = jnp.zeros((1, Wp), jnp.float32).at[0, D:D2].set(1.0)
    mtok = jnp.zeros((1, Wp), jnp.float32).at[0, D:D2].set(mask_token.reshape(-1))
    m = mask_bool.astype(jnp.float32).reshape(N, 1)

    tm, n_pad = _row_tile(N, max_tile=512)
    xp = _pad_rows(x.astype(jnp.float32), n_pad)
    mp = _pad_rows(m, n_pad)

    tok, mtok_out = pl.pallas_call(
        _encode_mask_kernel,
        out_shape=(jax.ShapeDtypeStruct((n_pad, Wp), jnp.float32),
                   jax.ShapeDtypeStruct((n_pad, Wp), jnp.float32)),
        grid=(n_pad // tm,),
        in_specs=[pl.BlockSpec((tm, F), lambda i: (i, 0)),
                  pl.BlockSpec((F, Wp), lambda i: (0, 0)),
                  pl.BlockSpec((1, Wp), lambda i: (0, 0)),
                  pl.BlockSpec((tm, 1), lambda i: (i, 0)),
                  pl.BlockSpec((1, Wp), lambda i: (0, 0)),
                  pl.BlockSpec((1, Wp), lambda i: (0, 0))],
        out_specs=(pl.BlockSpec((tm, Wp), lambda i: (i, 0)),
                   pl.BlockSpec((tm, Wp), lambda i: (i, 0))),
        compiler_params=pltpu.CompilerParams(dimension_semantics=("parallel",)),
    )(xp, w, b, mp, colmask, mtok)
    return tok[:N], mtok_out[:N]           # (N, Wp), true content in cols [:2D]


def pred_prob(p, hf, hidden_pad=128):
    """Fused Linear->ReLU->(lane-reduce Linear)->Sigmoid."""
    M, D = hf.shape
    w1 = (jnp.zeros((D, hidden_pad), jnp.float32)
          .at[:, :D].set(p["w1"])).astype(jnp.bfloat16)
    b1 = jnp.zeros((1, hidden_pad), jnp.float32).at[0, :D].set(p["b1"])
    w2 = jnp.zeros((1, hidden_pad), jnp.float32).at[0, :D].set(p["w2"].reshape(-1))
    b2 = p["b2"].reshape(1, 1).astype(jnp.float32)

    tm, n_pad = _row_tile(M, max_tile=512)
    xp = _pad_rows(hf, n_pad)

    out = pl.pallas_call(
        _pred_mlp_kernel,
        out_shape=jax.ShapeDtypeStruct((n_pad, 1), jnp.float32),
        grid=(n_pad // tm,),
        in_specs=[pl.BlockSpec((tm, D), lambda i: (i, 0)),
                  pl.BlockSpec((D, hidden_pad), lambda i: (0, 0)),
                  pl.BlockSpec((1, hidden_pad), lambda i: (0, 0)),
                  pl.BlockSpec((1, hidden_pad), lambda i: (0, 0)),
                  pl.BlockSpec((1, 1), lambda i: (0, 0))],
        out_specs=pl.BlockSpec((tm, 1), lambda i: (i, 0)),
        compiler_params=pltpu.CompilerParams(dimension_semantics=("parallel",)),
    )(xp, w1, b1, w2, b2)
    return out[:M]


def _prep_tf_weights(layers, nhead, d_model, dim_ff, Dp, DHp, FFp):
    """Host-side restack: per-head lane-padded QKV/Wo, lane-padded FFN/LN params.

    Weights -> bf16 (MXU operands); biases / LN params stay f32.
    Padded rows/cols are zero so padded activation lanes stay exactly zero.
    """
    L = len(layers)
    dh = d_model // nhead
    wqkv = np.zeros((L, Dp, 3 * nhead * DHp), np.float32)
    bqkv = np.zeros((L, 1, 3 * nhead * DHp), np.float32)
    wo = np.zeros((L, nhead * DHp, Dp), np.float32)
    bo = np.zeros((L, 1, Dp), np.float32)
    ln1g = np.zeros((L, 1, Dp), np.float32)
    ln1b = np.zeros((L, 1, Dp), np.float32)
    ff1w = np.zeros((L, Dp, FFp), np.float32)
    ff1b = np.zeros((L, 1, FFp), np.float32)
    ff2w = np.zeros((L, FFp, Dp), np.float32)
    ff2b = np.zeros((L, 1, Dp), np.float32)
    ln2g = np.zeros((L, 1, Dp), np.float32)
    ln2b = np.zeros((L, 1, Dp), np.float32)

    for l, lp in enumerate(layers):
        ipw = np.asarray(lp["in_proj_w"])      # (d, 3d): cols [Q | K | V], head-major
        ipb = np.asarray(lp["in_proj_b"])
        opw = np.asarray(lp["out_proj_w"])     # (d, d)
        opb = np.asarray(lp["out_proj_b"])
        for m in range(3):                     # q, k, v
            for h in range(nhead):
                src = m * d_model + h * dh
                dst = (m * nhead + h) * DHp
                wqkv[l, :d_model, dst:dst + dh] = ipw[:, src:src + dh]
                bqkv[l, 0, dst:dst + dh] = ipb[src:src + dh]
        for h in range(nhead):
            wo[l, h * DHp:h * DHp + dh, :d_model] = opw[h * dh:(h + 1) * dh, :]
        bo[l, 0, :d_model] = opb
        ln1g[l, 0, :d_model] = np.asarray(lp["ln1_g"])
        ln1b[l, 0, :d_model] = np.asarray(lp["ln1_b"])
        ff1w[l, :d_model, :dim_ff] = np.asarray(lp["ff1_w"])
        ff1b[l, 0, :dim_ff] = np.asarray(lp["ff1_b"])
        ff2w[l, :dim_ff, :d_model] = np.asarray(lp["ff2_w"])
        ff2b[l, 0, :d_model] = np.asarray(lp["ff2_b"])
        ln2g[l, 0, :d_model] = np.asarray(lp["ln2_g"])
        ln2b[l, 0, :d_model] = np.asarray(lp["ln2_b"])

    bf = lambda a: jnp.asarray(a, jnp.bfloat16)
    f32 = lambda a: jnp.asarray(a, jnp.float32)
    return [bf(wqkv), f32(bqkv), bf(wo), f32(bo), f32(ln1g), f32(ln1b),
            bf(ff1w), f32(ff1b), bf(ff2w), f32(ff2b), f32(ln2g), f32(ln2b)]


def transformer_stack(tokens_flat, valid_keys, layers, nhead, d_model, seq, bt,
                      eps=1e-5):
    """tokens_flat: (B_pad*seq, Dp) flattened padded slab (padded lanes zero);
    valid_keys: (num_blocks, 1, bt*seq) key-validity mask per grid block."""
    n_rows, Dp = tokens_flat.shape
    M = bt * seq
    nblk = n_rows // M
    L = len(layers)
    dh = d_model // nhead
    DHp = _round_up(dh, 128)                   # 128-lane aligned per-head slices
    dim_ff = layers[0]["ff1_w"].shape[1]
    FFp = _round_up(dim_ff, 128)

    weights = _prep_tf_weights(layers, nhead, d_model, dim_ff, Dp, DHp, FFp)

    kernel = functools.partial(_tf_stack_kernel, nhead=nhead, nlayer=L, dh=dh,
                               d_true=d_model, seq=seq, eps=eps)

    # TODO(synk): when the model scales (real dim_feedforward=2048, more layers)
    # stream weights per layer on v7x (64 MiB VMEM) via an innermost 'arbitrary'
    # layer grid axis instead of keeping the whole stack resident.
    def call(single_buffered):
        def const_spec(a):
            shape = a.shape
            nd = len(shape)
            if single_buffered:
                # constant index_map => single-buffer the resident weights
                return pl.BlockSpec(shape, lambda i: (0,) * nd,
                                    pipeline_mode=pl.Buffered(1))
            return pl.BlockSpec(shape, lambda i: (0,) * nd)

        in_specs = ([pl.BlockSpec((M, Dp), lambda i: (i, 0)),
                     pl.BlockSpec((1, 1, M), lambda i: (i, 0, 0))]
                    + [const_spec(a) for a in weights])
        return pl.pallas_call(
            kernel,
            out_shape=jax.ShapeDtypeStruct((n_rows, Dp), jnp.float32),
            grid=(nblk,),
            in_specs=in_specs,
            out_specs=pl.BlockSpec((M, Dp), lambda i: (i, 0)),
            compiler_params=pltpu.CompilerParams(
                dimension_semantics=("parallel",)),
        )(tokens_flat, valid_keys, *weights)

    try:
        return call(True)
    except Exception:
        # Fallback for JAX builds without BlockSpec(pipeline_mode=...) support.
        return call(False)


# ----------------------------------------------------------------------------
# model pieces (glue)
# ----------------------------------------------------------------------------

def mask_nodes(num_nodes, edge_index, mask_ratio, k_hop, key):
    """Deterministic re-implementation of TopModel.mask_nodes: random initial
    mask, then k-hop fan-in expansion over the induced-subgraph sources."""
    # TODO(synk): torch_geometric `subgraph(..., dim=1)` semantics approximated
    # by induced-subgraph source extraction on a fixed-size boolean node mask.
    n_mask = int(mask_ratio * num_nodes)
    perm = jax.random.permutation(key, num_nodes)
    init_idx = perm[:n_mask]
    node_mask = jnp.zeros(num_nodes, dtype=bool).at[init_idx].set(True)
    src = jnp.asarray(edge_index[0])
    dst = jnp.asarray(edge_index[1])
    current = node_mask
    acc = node_mask
    for _ in range(k_hop):
        edge_keep = (current[src] & current[dst]).astype(jnp.int32)
        fanin = jnp.zeros(num_nodes, jnp.int32).at[src].max(edge_keep) > 0
        current = fanin
        acc = acc | fanin
    return acc


def top_model_forward(params, G, args, rng):
    D = args["dim_hidden"]
    d_model = 2 * D
    Dp = _round_up(max(d_model, 128), 128)     # lane-dense activation width
    n_pm = G["x"].shape[0]
    n_aig = G["aig_x"].shape[0]

    # ---- masking (depends only on graph structure) ----
    if args["mask_aig"]:
        mask_bool = mask_nodes(n_aig, G["aig_edge_index"],
                               args["mask_ratio"], args["k_hop"], rng)
        pm_mask = jnp.zeros((n_pm,), dtype=bool)
        aig_mask = mask_bool
    else:
        mask_bool = mask_nodes(n_pm, G["edge_index"],
                               args["mask_ratio"], args["k_hop"], rng)
        pm_mask = mask_bool
        aig_mask = jnp.zeros((n_aig,), dtype=bool)
    mask_indices = jnp.where(mask_bool)[0]

    # ---- fused encoder + mask-token substitution (one kernel per modality) ----
    # TODO(synk): DeepCell/DeepGate GNN encoders are external modules; replaced
    # by deterministic fused linear projections of the node features.
    pm_tokens_p, pm_tokens_masked_p = encode_and_mask(
        params["deepcell"], G["x"], pm_mask, params["mask_token"], D, out_width=Dp)
    aig_tokens_p, aig_tokens_masked_p = encode_and_mask(
        params["deepgate"], G["aig_x"], aig_mask, params["mask_token"], D, out_width=Dp)

    # ---- pad per-batch sequences into one flat (B_pad*S, Dp) slab ----
    batch_pm = np.asarray(G["batch"])
    batch_aig = np.asarray(G["aig_batch"])
    num_batches = int(max(batch_pm.max(), batch_aig.max())) + 1
    pm_per_b = [np.where(batch_pm == b)[0] for b in range(num_batches)]
    aig_per_b = [np.where(batch_aig == b)[0] for b in range(num_batches)]
    S = _round_up(max(len(p_) + len(a_) for p_, a_ in zip(pm_per_b, aig_per_b)), 8)

    # batch-blocking: Bt batches per grid step so the shared matmuls see M = Bt*S
    bt = max(1, min(num_batches, pl.cdiv(128, S)))
    B_pad = _round_up(num_batches, bt)
    nblk = B_pad // bt

    gather_idx = np.zeros((B_pad, S), np.int32)
    valid = np.zeros((B_pad, S), np.float32)
    pm_pos, aig_pos = [], []
    for b in range(num_batches):
        p_idx, a_idx = pm_per_b[b], aig_per_b[b]
        seq_len = len(p_idx) + len(a_idx)
        gather_idx[b, :len(p_idx)] = p_idx
        gather_idx[b, len(p_idx):seq_len] = a_idx + n_pm
        valid[b, :seq_len] = 1.0
        pm_pos.extend((b * S + np.arange(len(p_idx))).tolist())
        aig_pos.extend((b * S + len(p_idx) + np.arange(len(a_idx))).tolist())

    # TODO(synk): these row gathers could be folded into the kernels with
    # PrefetchScalarGridSpec + pl.Element index_maps to save two HBM passes.
    all_tok = jnp.concatenate([pm_tokens_masked_p, aig_tokens_masked_p], axis=0)
    tokens_flat = all_tok[jnp.asarray(gather_idx)].reshape(B_pad * S, Dp)
    valid_keys = jnp.asarray(valid.reshape(nblk, 1, bt * S))

    # ---- full transformer stack, batch-blocked grid, single pallas_call ----
    out_flat = transformer_stack(tokens_flat, valid_keys, params["mask_tf"],
                                 args["tf_head"], d_model, S, bt)

    mcm_pm_tokens = out_flat[jnp.asarray(np.asarray(pm_pos, np.int32))][:, :d_model]
    mcm_aig_tokens = out_flat[jnp.asarray(np.asarray(aig_pos, np.int32))][:, :d_model]

    # ---- fused readout MLPs ----
    pm_prob = pred_prob(params["dc_pred"], mcm_pm_tokens[:, D:])
    aig_prob = pred_prob(params["dg_pred"], mcm_aig_tokens[:, D:])

    if args["mask_aig"]:
        gt_tokens, mcm_tokens = aig_tokens_p[:, :d_model], mcm_aig_tokens
    else:
        gt_tokens, mcm_tokens = pm_tokens_p[:, :d_model], mcm_pm_tokens
    return mcm_tokens, mask_indices, gt_tokens, pm_prob, aig_prob


# ----------------------------------------------------------------------------
# deterministic parameter construction
# ----------------------------------------------------------------------------

def init_params(key, args, pm_feat_dim, aig_feat_dim):
    D = args["dim_hidden"]
    d_model = 2 * D
    ff = args["dim_feedforward"]

    def nrm(k, shape, scale=0.02):
        return scale * jax.random.normal(k, shape, dtype=jnp.float32)

    keys = iter(jax.random.split(key, 64))
    params = {}
    params["deepcell"] = dict(ws=nrm(next(keys), (pm_feat_dim, D)),
                              bs=jnp.zeros((D,), jnp.float32),
                              wf=nrm(next(keys), (pm_feat_dim, D)),
                              bf=jnp.zeros((D,), jnp.float32))
    params["deepgate"] = dict(ws=nrm(next(keys), (aig_feat_dim, D)),
                              bs=jnp.zeros((D,), jnp.float32),
                              wf=nrm(next(keys), (aig_feat_dim, D)),
                              bf=jnp.zeros((D,), jnp.float32))
    params["mask_token"] = jax.random.normal(next(keys), (1, D), dtype=jnp.float32)

    layers = []
    for _ in range(args["tf_layer"]):
        layers.append(dict(
            in_proj_w=nrm(next(keys), (d_model, 3 * d_model)),
            in_proj_b=jnp.zeros((3 * d_model,), jnp.float32),
            out_proj_w=nrm(next(keys), (d_model, d_model)),
            out_proj_b=jnp.zeros((d_model,), jnp.float32),
            ln1_g=jnp.ones((d_model,), jnp.float32),
            ln1_b=jnp.zeros((d_model,), jnp.float32),
            ff1_w=nrm(next(keys), (d_model, ff)),
            ff1_b=jnp.zeros((ff,), jnp.float32),
            ff2_w=nrm(next(keys), (ff, d_model)),
            ff2_b=jnp.zeros((d_model,), jnp.float32),
            ln2_g=jnp.ones((d_model,), jnp.float32),
            ln2_b=jnp.zeros((d_model,), jnp.float32),
        ))
    params["mask_tf"] = layers
    params["dc_pred"] = dict(w1=nrm(next(keys), (D, D)),
                             b1=jnp.zeros((D,), jnp.float32),
                             w2=nrm(next(keys), (D, 1)),
                             b2=jnp.zeros((1,), jnp.float32))
    params["dg_pred"] = dict(w1=nrm(next(keys), (D, D)),
                             b1=jnp.zeros((D,), jnp.float32),
                             w2=nrm(next(keys), (D, 1)),
                             b2=jnp.zeros((1,), jnp.float32))
    return params


# ----------------------------------------------------------------------------
# main
# ----------------------------------------------------------------------------

if __name__ == "__main__":
    args = dict(dim_hidden=32, tf_head=4, tf_layer=2, dim_feedforward=128,
                mask_ratio=0.25, k_hop=2, mask_aig=False)
    # Note: torch default dim_feedforward is 2048; shrunk to 128 for the demo.

    N_PM_PER_BATCH, N_AIG_PER_BATCH, NUM_BATCH = 8, 8, 2
    PM_FEAT, AIG_FEAT = 16, 3
    n_pm = N_PM_PER_BATCH * NUM_BATCH
    n_aig = N_AIG_PER_BATCH * NUM_BATCH

    key = jax.random.PRNGKey(0)
    k_feat, k_aig, k_param, k_mask = jax.random.split(key, 4)

    # Deterministic "graph" (simple chains within each batch element).
    pm_edges = []
    for b in range(NUM_BATCH):
        off = b * N_PM_PER_BATCH
        for i in range(N_PM_PER_BATCH - 1):
            pm_edges.append((off + i, off + i + 1))
    pm_edge_index = np.asarray(pm_edges, dtype=np.int32).T          # (2, E)
    aig_edges = []
    for b in range(NUM_BATCH):
        off = b * N_AIG_PER_BATCH
        for i in range(N_AIG_PER_BATCH - 1):
            aig_edges.append((off + i, off + i + 1))
    aig_edge_index = np.asarray(aig_edges, dtype=np.int32).T

    G = dict(
        x=jax.random.normal(k_feat, (n_pm, PM_FEAT), dtype=jnp.float32),
        aig_x=jax.random.normal(k_aig, (n_aig, AIG_FEAT), dtype=jnp.float32),
        edge_index=pm_edge_index,
        aig_edge_index=aig_edge_index,
        batch=np.repeat(np.arange(NUM_BATCH), N_PM_PER_BATCH),
        aig_batch=np.repeat(np.arange(NUM_BATCH), N_AIG_PER_BATCH),
    )

    params = init_params(k_param, args, PM_FEAT, AIG_FEAT)

    mcm_tokens, mask_indices, gt_tokens, pm_prob, aig_prob = top_model_forward(
        params, G, args, k_mask)

    jax.block_until_ready((mcm_tokens, mask_indices, gt_tokens, pm_prob, aig_prob))

    assert mcm_tokens.shape == (n_pm, 2 * args["dim_hidden"])
    assert gt_tokens.shape == (n_pm, 2 * args["dim_hidden"])
    assert pm_prob.shape == (n_pm, 1)
    assert aig_prob.shape == (n_aig, 1)
    assert bool(jnp.all(jnp.isfinite(mcm_tokens)))
    assert bool(jnp.all(jnp.isfinite(pm_prob))) and bool(jnp.all(jnp.isfinite(aig_prob)))
    print("KERNEL_OK")
</pallas_src>

<mosaic_0001>
module attributes {stable_mosaic.version = 11 : i64} {
  func.func @_encode_mask_kernel(%arg0: i32, %arg1: memref<16x16xf32, #tpu.memory_space<vmem>>, %arg2: memref<16x128xbf16, #tpu.memory_space<vmem>>, %arg3: memref<1x128xf32, #tpu.memory_space<vmem>>, %arg4: memref<16x1xf32, #tpu.memory_space<vmem>>, %arg5: memref<1x128xf32, #tpu.memory_space<vmem>>, %arg6: memref<1x128xf32, #tpu.memory_space<vmem>>, %arg7: memref<16x128xf32, #tpu.memory_space<vmem>>, %arg8: memref<16x128xf32, #tpu.memory_space<vmem>>) attributes {dimension_semantics = [#tpu.dimension_semantics<parallel>], iteration_bounds = array<i64: 1>, scalar_prefetch = 0 : i64, scratch_operands = 0 : i64, tpu.core_type = #tpu.core_type<tc>, window_params = [{transform_indices = @transform_0, window_bounds = array<i64: 16, 16>}, {pipeline_mode = #tpu.pipeline_mode<synchronous>, transform_indices = @transform_1, window_bounds = array<i64: 16, 128>}, {pipeline_mode = #tpu.pipeline_mode<synchronous>, transform_indices = @transform_2, window_bounds = array<i64: 1, 128>}, {transform_indices = @transform_3, window_bounds = array<i64: 16, 1>}, {pipeline_mode = #tpu.pipeline_mode<synchronous>, transform_indices = @transform_4, window_bounds = array<i64: 1, 128>}, {pipeline_mode = #tpu.pipeline_mode<synchronous>, transform_indices = @transform_5, window_bounds = array<i64: 1, 128>}, {transform_indices = @transform_6, window_bounds = array<i64: 16, 128>}, {transform_indices = @transform_7, window_bounds = array<i64: 16, 128>}]} {
    %c0 = arith.constant 0 : index
    %c0_0 = arith.constant 0 : index
    %0 = vector.load %arg1[%c0, %c0_0] : memref<16x16xf32, #tpu.memory_space<vmem>>, vector<16x16xf32>
    %1 = arith.truncf %0 : vector<16x16xf32> to vector<16x16xbf16>
    %c0_1 = arith.constant 0 : index
    %c0_2 = arith.constant 0 : index
    %2 = vector.load %arg2[%c0_1, %c0_2] : memref<16x128xbf16, #tpu.memory_space<vmem>>, vector<16x128xbf16>
    %cst = arith.constant dense<0.000000e+00> : vector<16x128xf32>
    %3 = tpu.matmul %1, %2, %cst {dimension_numbers = #tpu.dot_dimension_numbers<[1], [0], [0], [1], [0, 0, 1, 1], [], []>} : vector<16x16xbf16>, vector<16x128xbf16>, vector<16x128xf32> -> vector<16x128xf32>
    %c0_3 = arith.constant 0 : index
    %c0_4 = arith.constant 0 : index
    %4 = vector.load %arg3[%c0_3, %c0_4] : memref<1x128xf32, #tpu.memory_space<vmem>>, vector<1x128xf32>
    %5 = vector.broadcast %4 : vector<1x128xf32> to vector<16x128xf32>
    %6 = arith.addf %3, %5 : vector<16x128xf32>
    %cst_5 = arith.constant 0.000000e+00 : f32
    %7 = vector.broadcast %cst_5 : f32 to vector<16x128xf32>
    %8 = arith.maximumf %6, %7 : vector<16x128xf32>
    %c0_6 = arith.constant 0 : index
    %c0_7 = arith.constant 0 : index
    %9 = vector.load %arg7[%c0_6, %c0_7] : memref<16x128xf32, #tpu.memory_space<vmem>>, vector<16x128xf32>
    tpu.vector_store %arg7[%c0_6, %c0_7], %8 {strides = array<i32>} : memref<16x128xf32, #tpu.memory_space<vmem>>, vector<16x128xf32>,
    %c0_8 = arith.constant 0 : index
    %c0_9 = arith.constant 0 : index
    %10 = vector.load %arg4[%c0_8, %c0_9] : memref<16x1xf32, #tpu.memory_space<vmem>>, vector<16x1xf32>
    %c0_10 = arith.constant 0 : index
    %c0_11 = arith.constant 0 : index
    %11 = vector.load %arg5[%c0_10, %c0_11] : memref<1x128xf32, #tpu.memory_space<vmem>>, vector<1x128xf32>
    %12 = vector.broadcast %10 : vector<16x1xf32> to vector<16x128xf32>
    %13 = vector.broadcast %11 : vector<1x128xf32> to vector<16x128xf32>
    %14 = arith.mulf %12, %13 : vector<16x128xf32>
    %cst_12 = arith.constant 5.000000e-01 : f32
    %15 = vector.broadcast %cst_12 : f32 to vector<16x128xf32>
    %16 = arith.cmpf ogt, %14, %15 : vector<16x128xf32>
    %c0_13 = arith.constant 0 : index
    %c0_14 = arith.constant 0 : index
    %17 = vector.load %arg6[%c0_13, %c0_14] : memref<1x128xf32, #tpu.memory_space<vmem>>, vector<1x128xf32>
    %18 = vector.shape_cast %17 : vector<1x128xf32> to vector<1x128xf32>
    %19 = vector.broadcast %18 : vector<1x128xf32> to vector<16x128xf32>
    %20 = arith.select %16, %19, %8 : vector<16x128xi1>, vector<16x128xf32>
    %c0_15 = arith.constant 0 : index
    %c0_16 = arith.constant 0 : index
    %21 = vector.load %arg8[%c0_15, %c0_16] : memref<16x128xf32, #tpu.memory_space<vmem>>, vector<16x128xf32>
    tpu.vector_store %arg8[%c0_15, %c0_16], %20 {strides = array<i32>} : memref<16x128xf32, #tpu.memory_space<vmem>>, vector<16x128xf32>,
    return
  }
  func.func @transform_0(%arg0: i32) -> (i32, i32) {
    %c0_i32 = arith.constant 0 : i32
    %c0_i32_0 = arith.constant 0 : i32
    return %arg0, %c0_i32 : i32, i32
  }
  func.func @transform_1(%arg0: i32) -> (i32, i32) {
    %c0_i32 = arith.constant 0 : i32
    %c0_i32_0 = arith.constant 0 : i32
    %c0_i32_1 = arith.constant 0 : i32
    return %c0_i32, %c0_i32_0 : i32, i32
  }
  func.func @transform_2(%arg0: i32) -> (i32, i32) {
    %c0_i32 = arith.constant 0 : i32
    %c0_i32_0 = arith.constant 0 : i32
    %c0_i32_1 = arith.constant 0 : i32
    return %c0_i32, %c0_i32_0 : i32, i32
  }
  func.func @transform_3(%arg0: i32) -> (i32, i32) {
    %c0_i32 = arith.constant 0 : i32
    %c0_i32_0 = arith.constant 0 : i32
    return %arg0, %c0_i32 : i32, i32
  }
  func.func @transform_4(%arg0: i32) -> (i32, i32) {
    %c0_i32 = arith.constant 0 : i32
    %c0_i32_0 = arith.constant 0 : i32
    %c0_i32_1 = arith.constant 0 : i32
    return %c0_i32, %c0_i32_0 : i32, i32
  }
  func.func @transform_5(%arg0: i32) -> (i32, i32) {
    %c0_i32 = arith.constant 0 : i32
    %c0_i32_0 = arith.constant 0 : i32
    %c0_i32_1 = arith.constant 0 : i32
    return %c0_i32, %c0_i32_0 : i32, i32
  }
  func.func @transform_6(%arg0: i32) -> (i32, i32) {
    %c0_i32 = arith.constant 0 : i32
    %c0_i32_0 = arith.constant 0 : i32
    return %arg0, %c0_i32 : i32, i32
  }
  func.func @transform_7(%arg0: i32) -> (i32, i32) {
    %c0_i32 = arith.constant 0 : i32
    %c0_i32_0 = arith.constant 0 : i32
    return %arg0, %c0_i32 : i32, i32
  }
}

</mosaic_0001>

<bundles_post_ra>
// kernel: tpu_custom_call.1
= control target key start
LH: loop header
LB: loop body
LE: loop exit
PB: predicated region body
PF: predicated region fallthrough
CT: control target
= control target key end

     0   :  { %13 = vsyncpa [#allocation3], 0  ;;  %s320_s0 = inlined_call_operand.vmem [shape: f32[16,16], index: 0, kind: input, shape index: {}]   ;;  %s321_s1 = inlined_call_operand.hbm [shape: bf16[16,128], index: 1, kind: input, shape index: {}]   ;;  %s322_s2 = inlined_call_operand.vmem [shape: f32[1,128], index: 2, kind: input, shape index: {}]   ;;  %s323_s3 = inlined_call_operand.vmem [shape: f32[16,1], index: 3, kind: input, shape index: {}]   ;;  %s324_s4 = inlined_call_operand.vmem [shape: f32[1,128], index: 4, kind: input, shape index: {}]   ;;  %s325_s5 = inlined_call_operand.vmem [shape: f32[1,128], index: 5, kind: input, shape index: {}]   ;;  %s326_s6 = inlined_call_operand.hbm [shape: f32[16,128], index: 6, kind: output, shape index: {0}]   ;;  %s327_s7 = inlined_call_operand.hbm [shape: f32[16,128], index: 7, kind: output, shape index: {1}]  }
   0x1   :  { %14 = vsyncpa [#allocation4], 0 }
   0x2   :  { %15 = vsyncpa [#allocation7], 0  ;;  %s22_s26 = sshll.u32 %s321_s1, 4  ;;  %s242_s27 = smov [#allocation2]   ;;  %s23_s26 = int_to_ptr.hbm [resolvable:$true] %s22_s26 }
   0x3   :  { %s24_s28 = sshll.u32 %s242_s27, 4  ;;  %s243_s29 = smov 64   ;;  %s25_s28 = int_to_ptr.vmem [resolvable:$true] %s24_s28 }
   0x4   :  { %s244_s30 = smov 4  }
   0x5   :  { %30 = dma.hbm_to_vmem [thread:$0]  %s23_s26, 128, %s25_s28, [#allocation3], %s243_s29, %s243_s29, %s244_s30  }
   0x6   :  { %236 = dma.done.wait [#allocation3], 128  }
   0x7   :  { %237 = vsyncadd [#allocation3], 4294967168  ;;  %v245_v0 = vmov 0   ;;  %v151_v1 = vld [vmem:[#allocation2] sm:$0xff]  ;;  %v45_v3 = vld [vmem:[%s320_s0 + $0x8] sm:$0xff]  ;;  %vm59_vm0 = vcmask 130048  }
   0x8   :  { %160 = vset.pattern.permute.xlu0 %v245_v0  ;;  %v44_v2 = vld [vmem:[%s320_s0] sm:$0xff]  ;;  %70 = vmatpush.bf16.msra.mxu0 %v151_v1  ;;  %v82_v6 = vld [vmem:[%s323_s3 + $0x8] sm:$0xff]  ;;  %s115_s22 = sshll.u32 %s326_s6, 4  ;;  %s248_s26 = smov 128   ;;  %s116_s22 = int_to_ptr.hbm [resolvable:$true] %s115_s22 }
   0x9   :  { %v46_v4 = vpack.c.bf16 %v45_v3, %v44_v2  ;;  %v81_v5 = vld [vmem:[%s323_s3] sm:$0xff]  ;;  %s246_s3 = smov [#allocation5]   ;;  %s249_s6 = smov 8  }
   0xa   :  { %86 = vperm.xlu0 %160, %v81_v5   ;;  %v161_v7 = vld [vmem:[%s324_s4] ss:$0 sm:$0xff]  ;;  %s113_s4 = sshll.u32 %s246_s3, 4  ;;  %s114_s4 = int_to_ptr.vmem [resolvable:$true] %s113_s4 }
   0xb   :  { %150 = vmatmul.msk.bf16.vlgmr.msra.gmra.mxu0 %vm59_vm0, %v46_v4  ;;  %v162_v9 = vld [vmem:[%s322_s2] ss:$0 sm:$0xff]  ;;  %s247_s2 = smov [#allocation6]  }
   0xc   :  { %v163_v13 = vld [vmem:[%s325_s5] ss:$0 sm:$0xff]  ;;  %s126_s23 = sshll.u32 %s247_s2, 4  ;;  %s128_s5 = sshll.u32 %s327_s7, 4  ;;  %s127_s23 = int_to_ptr.vmem [resolvable:$true] %s126_s23  ;;  %s129_s5 = int_to_ptr.hbm [resolvable:$true] %s128_s5 }
  0x12   :  { %91 = vperm.xlu0 %160, %v82_v6  }
  0x7c   :  { %v87_v8 = vpop.permute.xlu0 %86 }
  0x7d   :  { %v97_v10 = vmul.f32 %v161_v7, %v87_v8 }
  0x7f   :  { %vm99_vm1 = vcmp.gt.f32.partialorder %v97_v10, 0.5 }
  0x84   :  { %v92_v16 = vpop.permute.xlu0 %91 }
  0x85   :  { %v98_v17 = vmul.f32 %v161_v7, %v92_v16 }
  0x87   :  { %vm100_vm2 = vcmp.gt.f32.partialorder %v98_v17, 0.5 }
  0x88   :  { %v72_v11 = vpop.f32.mrf.mxu0 }
  0x89   :  { %v73_v12 = vadd.f32 %v162_v9, %v72_v11 }
  0x8b   :  { %v77_v14 = vmax.f32 %v73_v12, 0.0 }
  0x8d   :  { %79 = vst [vmem:[#allocation5] sm:$0xff] %v77_v14  ;;  %v105_v15 = vsel %vm99_vm1, %v163_v13, %v77_v14 }
  0x8e   :  { %107 = vst [vmem:[#allocation6] sm:$0xff] %v105_v15 }
  0x90   :  { %v74_v18 = vpop.f32.mrf.mxu0 }
  0x91   :  { %v75_v19 = vadd.f32 %v162_v9, %v74_v18 }
  0x93   :  { %v78_v20 = vmax.f32 %v75_v19, 0.0 }
  0x95   :  { %80 = vst [vmem:[#allocation5 + $0x8] sm:$0xff] %v78_v20  ;;  %v106_v21 = vsel %vm100_vm2, %v163_v13, %v78_v20 }
  0x96   :  { %108 = vst [vmem:[#allocation6 + $0x8] sm:$0xff] %v106_v21  ;;  %121 = dma.vmem_to_hbm [thread:$0]  %s114_s4, 256, %s116_s22, [#allocation4], %s248_s26, %s248_s26, %s249_s6  }
  0x97   :  { %134 = dma.vmem_to_hbm [thread:$0]  %s127_s23, 256, %s129_s5, [#allocation7], %s248_s26, %s248_s26, %s249_s6  }
  0x98   :  { %238 = dma.done.wait [#allocation4], 256  }
  0x99   :  { %239 = vsyncadd [#allocation4], 4294967040 }
  0x9a   :  { %240 = dma.done.wait [#allocation7], 256  }
  0x9b   :  { %241 = vsyncadd [#allocation7], 4294967040 }
  0x9c   :  { %143 = vsyncpa [#allocation3], 1 }
  0x9d   :  { %144 = vsyncpa [#allocation4], 1 }
  0x9e   :  { %145 = vsyncpa [#allocation7], 1 }

</bundles_post_ra>
